<compile_context>
chip_gen: v7x
topology: tpu7x:2x2x1
jax: 0.10.0
libtpu: 0.0.40
codegen_flags: <defaults>
</compile_context>

<pallas_src>
import jax
import jax.numpy as jnp
from jax.experimental import pallas as pl
from jax.experimental.pallas import tpu as pltpu

_LANE = 128
_VMEM_SAMPLE_BUDGET = 36 * 1024 * 1024   # per-step working-set budget
_VMEM_LIMIT_CAP = 48 * 1024 * 1024       # stay under v7x's 64 MiB physical VMEM


def _round_up(v, m):
    return ((v + m - 1) // m) * m


def _pad_last(a, size):
    pad = size - a.shape[-1]
    if pad <= 0:
        return a
    cfg = [(0, 0)] * a.ndim
    cfg[-1] = (0, pad)
    return jnp.pad(a, cfg)


def _pick_b_tile(n, per_sample_bytes, budget=_VMEM_SAMPLE_BUDGET):
    """Largest divisor of n (<= 8) fitting the VMEM budget, preferring >= 2
    grid steps so the 'parallel' batch axis can use both v7x TensorCores."""
    cands = [d for d in range(1, min(n, 8) + 1) if n % d == 0]
    fits = [d for d in cands if d * per_sample_bytes <= budget] or [1]
    multi = [d for d in fits if n // d >= 2]
    return max(multi) if multi else max(fits)


def _lane_shift(arr2d, delta):
    """out[:, p] = arr2d[:, (p + delta) % L]  (static slices + lane concat;
    wrapped entries are zeroed by the caller's boundary mask)."""
    l = arr2d.shape[-1]
    d = delta % l
    if d == 0:
        return arr2d
    return jnp.concatenate([arr2d[:, d:], arr2d[:, :d]], axis=1)


def encoder_forward(x_nchw, w_conv, b_conv, w_head, b_head,
                    compute_dtype=jnp.bfloat16):
    """Forward pass.  x_nchw: (N, C, H, W) float32.  Returns (N, F) float32."""
    n, c, h, w = x_nchw.shape
    hidden = w_conv.shape[0]
    feat = w_head.shape[1]
    k = w_conv.shape[2]
    pad = k // 2
    hw = h * w
    hwp = _round_up(hw, _LANE)          # lane-dense flattened spatial axis
    f_pad = _round_up(feat, _LANE)      # lane-dense output features

    dsize = jnp.dtype(compute_dtype).itemsize
    # rough per-sample VMEM working set: image slab + shifted taps (compute
    # dtype) + conv/act f32 temporaries.
    per_sample = hwp * (c * dsize * 4 + hidden * 4 * 3)
    b_tile = _pick_b_tile(n, per_sample)
    n_tiles = n // b_tile

    # Tap offsets (PyTorch cross-correlation convention), tap-major ordering.
    offsets = [(kh - pad, kw - pad) for kh in range(k) for kw in range(k)]

    # ---- Inputs (wrapper-side prep is metadata-only reshapes + tiny constants).
    x3 = x_nchw.reshape(n, c, hw)
    x3 = _pad_last(x3, hwp).astype(compute_dtype)                   # (N, C, HWp)

    # Per-tap conv weights: w9[t] = w_conv[:, :, kh, kw], t = kh*k + kw.
    w9 = jnp.transpose(w_conv, (2, 3, 0, 1)).reshape(k * k, hidden, c)
    w9 = w9.astype(compute_dtype)                                   # (K2, HID, C)
    bc2 = b_conv.reshape(hidden, 1).astype(jnp.float32)             # (HID, 1)
    wh_p = _pad_last(w_head, f_pad).astype(jnp.float32)             # (HID, F_PAD)
    bh2 = _pad_last(b_head.reshape(1, feat), f_pad).astype(jnp.float32)

    # Precomputed boundary masks (one per tap) and 1/HW pooling weights.
    lane = jnp.arange(hwp, dtype=jnp.int32)
    row_i = lane // w
    col_i = lane % w
    valid = lane < hw
    masks = [((row_i + dh >= 0) & (row_i + dh < h) &
              (col_i + dw >= 0) & (col_i + dw < w) & valid)
             for dh, dw in offsets]
    masks9 = jnp.stack(masks).astype(compute_dtype).reshape(k * k, 1, hwp)
    poolw = (valid.astype(jnp.float32) / float(hw)).reshape(1, hwp)

    def kernel(x_ref, w9_ref, m9_ref, bc_ref, pw_ref, wh_ref, bh_ref, o_ref):
        pooled_cols = []
        for b in range(b_tile):                    # static unrolled (<= 8)
            x_b = x_ref[b]                         # (C, HWp) compute dtype
            conv = None
            for t, (dh, dw) in enumerate(offsets):
                delta = dh * w + dw
                rolled = _lane_shift(x_b, delta)   # (C, HWp)
                tap = rolled * m9_ref[t]           # zero the out-of-image taps
                part = jnp.dot(w9_ref[t], tap,     # (HID, C) @ (C, HWp) on MXU
                               preferred_element_type=jnp.float32)
                conv = part if conv is None else conv + part
            act = jnp.maximum(conv + bc_ref[...], 0.0)           # (HID, HWp) f32
            # Global average pool: weighted lane reduction (VPU/XLU, no MXU).
            pooled_cols.append(
                jnp.sum(act * pw_ref[...], axis=1, keepdims=True))  # (HID, 1)
        pooled = (pooled_cols[0] if b_tile == 1
                  else jnp.concatenate(pooled_cols, axis=1))      # (HID, B_t)
        # Head: pooled^T @ wh without an explicit transpose (contract dim 0).
        feats = jax.lax.dot_general(
            pooled, wh_ref[...],
            dimension_numbers=(((0,), (0,)), ((), ())),
            preferred_element_type=jnp.float32) + bh_ref[...]      # (B_t, F_PAD)
        o_ref[0] = feats

    # Image stream spec; deepen buffering only when the grid is long enough.
    x_spec_kwargs = {}
    if n_tiles >= 3 and hasattr(pl, "Buffered"):
        x_spec_kwargs["pipeline_mode"] = pl.Buffered(3)
    try:
        x_spec = pl.BlockSpec((b_tile, c, hwp), lambda i: (i, 0, 0),
                              **x_spec_kwargs)
    except TypeError:   # older BlockSpec without pipeline_mode
        x_spec = pl.BlockSpec((b_tile, c, hwp), lambda i: (i, 0, 0))

    const_bytes = 2 * (w9.size * w9.dtype.itemsize
                       + masks9.size * masks9.dtype.itemsize
                       + (bc2.size + poolw.size + wh_p.size + bh2.size) * 4)
    vmem_limit = int(min(_VMEM_LIMIT_CAP,
                         max(32 * 1024 * 1024,
                             2 * (b_tile * per_sample + const_bytes))))

    out = pl.pallas_call(
        kernel,
        out_shape=jax.ShapeDtypeStruct((n_tiles, b_tile, f_pad), jnp.float32),
        grid=(n_tiles,),
        in_specs=[
            x_spec,
            pl.BlockSpec((k * k, hidden, c), lambda i: (0, 0, 0)),
            pl.BlockSpec((k * k, 1, hwp), lambda i: (0, 0, 0)),
            pl.BlockSpec((hidden, 1), lambda i: (0, 0)),
            pl.BlockSpec((1, hwp), lambda i: (0, 0)),
            pl.BlockSpec((hidden, f_pad), lambda i: (0, 0)),
            pl.BlockSpec((1, f_pad), lambda i: (0, 0)),
        ],
        out_specs=pl.BlockSpec((1, b_tile, f_pad), lambda i: (i, 0, 0)),
        compiler_params=pltpu.CompilerParams(
            dimension_semantics=("parallel",),
            vmem_limit_bytes=vmem_limit),
    )(x3, w9, masks9, bc2, poolw, wh_p, bh2)

    return out.reshape(n, f_pad)[:, :feat]


def _reference_forward(x_nchw, w_conv, b_conv, w_head, b_head):
    """Pure-JAX reference (mirrors the PyTorch model semantics)."""
    conv = jax.lax.conv_general_dilated(
        x_nchw, w_conv, window_strides=(1, 1), padding="SAME",
        dimension_numbers=("NCHW", "OIHW", "NCHW"))
    conv = conv + b_conv[None, :, None, None]
    act = jnp.maximum(conv, 0.0)
    pooled = jnp.mean(act, axis=(2, 3))                        # (N, hidden)
    return pooled @ w_head + b_head[None, :]                   # (N, F)


if __name__ == "__main__":
    # Small shapes consistent with the module's forward(x) on an image batch.
    N, C, H, W = 2, 4, 16, 16
    HIDDEN, FEAT, K = 32, 32, 3

    key = jax.random.PRNGKey(0)
    kx, kwc, kbc, kwh, kbh, kx8 = jax.random.split(key, 6)

    x = jax.random.normal(kx, (N, C, H, W), dtype=jnp.float32)

    # Deterministic synthetic parameters (no checkpoint loading).
    w_conv = 0.05 * jax.random.normal(kwc, (HIDDEN, C, K, K), dtype=jnp.float32)
    b_conv = 0.01 * jax.random.normal(kbc, (HIDDEN,), dtype=jnp.float32)
    w_head = 0.05 * jax.random.normal(kwh, (HIDDEN, FEAT), dtype=jnp.float32)
    b_head = 0.01 * jax.random.normal(kbh, (FEAT,), dtype=jnp.float32)

    ref = jax.block_until_ready(
        _reference_forward(x, w_conv, b_conv, w_head, b_head))

    # Default bf16 DMA/MXU path (f32 accumulation) -- now default on all gens.
    out_bf16 = jax.block_until_ready(
        encoder_forward(x, w_conv, b_conv, w_head, b_head))
    assert out_bf16.shape == (N, FEAT)
    assert jnp.allclose(out_bf16, ref, atol=5e-2, rtol=5e-2), "bf16 mismatch"

    # f32 path, tight tolerance.
    out_f32 = jax.block_until_ready(
        encoder_forward(x, w_conv, b_conv, w_head, b_head,
                        compute_dtype=jnp.float32))
    assert jnp.allclose(out_f32, ref, atol=2e-4, rtol=2e-4), "f32 mismatch"

    # Batch 8: b_tile=4 (two grid steps, megacore-friendly) and the unrolled
    # per-sample loop / pooled-concat path.
    x8 = jax.random.normal(kx8, (8, C, H, W), dtype=jnp.float32)
    ref8 = jax.block_until_ready(
        _reference_forward(x8, w_conv, b_conv, w_head, b_head))
    out8 = jax.block_until_ready(
        encoder_forward(x8, w_conv, b_conv, w_head, b_head))
    assert jnp.allclose(out8, ref8, atol=5e-2, rtol=5e-2), "batch-8 mismatch"

    # Odd spatial size (HW=100 lane-padded to 128): exercises pad/pool masks.
    x_odd = jax.random.normal(kx, (2, C, 10, 10), dtype=jnp.float32)
    ref_odd = jax.block_until_ready(
        _reference_forward(x_odd, w_conv, b_conv, w_head, b_head))
    out_odd = jax.block_until_ready(
        encoder_forward(x_odd, w_conv, b_conv, w_head, b_head))
    assert jnp.allclose(out_odd, ref_odd, atol=5e-2, rtol=5e-2), "odd-HW mismatch"

    print("KERNEL_OK")
</pallas_src>

<mosaic_0001>
module attributes {stable_mosaic.version = 11 : i64} {
  func.func @kernel(%arg0: i32, %arg1: memref<1x4x256xbf16, #tpu.memory_space<vmem>>, %arg2: memref<9x32x4xbf16, #tpu.memory_space<vmem>>, %arg3: memref<9x1x256xbf16, #tpu.memory_space<vmem>>, %arg4: memref<32x1xf32, #tpu.memory_space<vmem>>, %arg5: memref<1x256xf32, #tpu.memory_space<vmem>>, %arg6: memref<32x128xf32, #tpu.memory_space<vmem>>, %arg7: memref<1x128xf32, #tpu.memory_space<vmem>>, %arg8: memref<1x1x128xf32, #tpu.memory_space<vmem>>) attributes {dimension_semantics = [#tpu.dimension_semantics<parallel>], iteration_bounds = array<i64: 2>, scalar_prefetch = 0 : i64, scratch_operands = 0 : i64, tpu.core_type = #tpu.core_type<tc>, window_params = [{transform_indices = @transform_0, window_bounds = array<i64: 1, 4, 256>}, {pipeline_mode = #tpu.pipeline_mode<synchronous>, transform_indices = @transform_1, window_bounds = array<i64: 9, 32, 4>}, {pipeline_mode = #tpu.pipeline_mode<synchronous>, transform_indices = @transform_2, window_bounds = array<i64: 9, 1, 256>}, {pipeline_mode = #tpu.pipeline_mode<synchronous>, transform_indices = @transform_3, window_bounds = array<i64: 32, 1>}, {pipeline_mode = #tpu.pipeline_mode<synchronous>, transform_indices = @transform_4, window_bounds = array<i64: 1, 256>}, {pipeline_mode = #tpu.pipeline_mode<synchronous>, transform_indices = @transform_5, window_bounds = array<i64: 32, 128>}, {pipeline_mode = #tpu.pipeline_mode<synchronous>, transform_indices = @transform_6, window_bounds = array<i64: 1, 128>}, {transform_indices = @transform_7, window_bounds = array<i64: 1, 1, 128>}]} {
    %c0 = arith.constant 0 : index
    %c0_0 = arith.constant 0 : index
    %c0_1 = arith.constant 0 : index
    %0 = vector.load %arg1[%c0, %c0_0, %c0_1] : memref<1x4x256xbf16, #tpu.memory_space<vmem>>, vector<1x4x256xbf16>
    %1 = vector.shape_cast %0 : vector<1x4x256xbf16> to vector<4x256xbf16>
    %2 = vector.extract_strided_slice %1 {offsets = [0, 239], sizes = [4, 17], strides = [1, 1]} : vector<4x256xbf16> to vector<4x17xbf16>
    %3 = vector.extract_strided_slice %1 {offsets = [0, 0], sizes = [4, 239], strides = [1, 1]} : vector<4x256xbf16> to vector<4x239xbf16>
    %4 = tpu.concatenate %2, %3 in 1 : vector<4x17xbf16>, vector<4x239xbf16> -> vector<4x256xbf16>
    %c0_2 = arith.constant 0 : index
    %c0_3 = arith.constant 0 : index
    %c0_4 = arith.constant 0 : index
    %5 = vector.load %arg3[%c0_2, %c0_3, %c0_4] : memref<9x1x256xbf16, #tpu.memory_space<vmem>>, vector<1x1x256xbf16>
    %6 = vector.shape_cast %5 : vector<1x1x256xbf16> to vector<1x256xbf16>
    %7 = vector.broadcast %6 : vector<1x256xbf16> to vector<4x256xbf16>
    %8 = arith.mulf %4, %7 : vector<4x256xbf16>
    %c0_5 = arith.constant 0 : index
    %c0_6 = arith.constant 0 : index
    %c0_7 = arith.constant 0 : index
    %9 = vector.load %arg2[%c0_5, %c0_6, %c0_7] : memref<9x32x4xbf16, #tpu.memory_space<vmem>>, vector<1x32x4xbf16>
    %10 = vector.shape_cast %9 : vector<1x32x4xbf16> to vector<32x4xbf16>
    %cst = arith.constant dense<0.000000e+00> : vector<32x256xf32>
    %11 = tpu.matmul %10, %8, %cst {dimension_numbers = #tpu.dot_dimension_numbers<[1], [0], [0], [1], [0, 0, 1, 1], [], []>} : vector<32x4xbf16>, vector<4x256xbf16>, vector<32x256xf32> -> vector<32x256xf32>
    %12 = vector.extract_strided_slice %1 {offsets = [0, 240], sizes = [4, 16], strides = [1, 1]} : vector<4x256xbf16> to vector<4x16xbf16>
    %13 = vector.extract_strided_slice %1 {offsets = [0, 0], sizes = [4, 240], strides = [1, 1]} : vector<4x256xbf16> to vector<4x240xbf16>
    %14 = tpu.concatenate %12, %13 in 1 : vector<4x16xbf16>, vector<4x240xbf16> -> vector<4x256xbf16>
    %c1 = arith.constant 1 : index
    %c0_8 = arith.constant 0 : index
    %c0_9 = arith.constant 0 : index
    %15 = vector.load %arg3[%c1, %c0_8, %c0_9] : memref<9x1x256xbf16, #tpu.memory_space<vmem>>, vector<1x1x256xbf16>
    %16 = vector.shape_cast %15 : vector<1x1x256xbf16> to vector<1x256xbf16>
    %17 = vector.broadcast %16 : vector<1x256xbf16> to vector<4x256xbf16>
    %18 = arith.mulf %14, %17 : vector<4x256xbf16>
    %c1_10 = arith.constant 1 : index
    %c0_11 = arith.constant 0 : index
    %c0_12 = arith.constant 0 : index
    %19 = vector.load %arg2[%c1_10, %c0_11, %c0_12] : memref<9x32x4xbf16, #tpu.memory_space<vmem>>, vector<1x32x4xbf16>
    %20 = vector.shape_cast %19 : vector<1x32x4xbf16> to vector<32x4xbf16>
    %cst_13 = arith.constant dense<0.000000e+00> : vector<32x256xf32>
    %21 = tpu.matmul %20, %18, %cst_13 {dimension_numbers = #tpu.dot_dimension_numbers<[1], [0], [0], [1], [0, 0, 1, 1], [], []>} : vector<32x4xbf16>, vector<4x256xbf16>, vector<32x256xf32> -> vector<32x256xf32>
    %22 = arith.addf %11, %21 : vector<32x256xf32>
    %23 = vector.extract_strided_slice %1 {offsets = [0, 241], sizes = [4, 15], strides = [1, 1]} : vector<4x256xbf16> to vector<4x15xbf16>
    %24 = vector.extract_strided_slice %1 {offsets = [0, 0], sizes = [4, 241], strides = [1, 1]} : vector<4x256xbf16> to vector<4x241xbf16>
    %25 = tpu.concatenate %23, %24 in 1 : vector<4x15xbf16>, vector<4x241xbf16> -> vector<4x256xbf16>
    %c2 = arith.constant 2 : index
    %c0_14 = arith.constant 0 : index
    %c0_15 = arith.constant 0 : index
    %26 = vector.load %arg3[%c2, %c0_14, %c0_15] : memref<9x1x256xbf16, #tpu.memory_space<vmem>>, vector<1x1x256xbf16>
    %27 = vector.shape_cast %26 : vector<1x1x256xbf16> to vector<1x256xbf16>
    %28 = vector.broadcast %27 : vector<1x256xbf16> to vector<4x256xbf16>
    %29 = arith.mulf %25, %28 : vector<4x256xbf16>
    %c2_16 = arith.constant 2 : index
    %c0_17 = arith.constant 0 : index
    %c0_18 = arith.constant 0 : index
    %30 = vector.load %arg2[%c2_16, %c0_17, %c0_18] : memref<9x32x4xbf16, #tpu.memory_space<vmem>>, vector<1x32x4xbf16>
    %31 = vector.shape_cast %30 : vector<1x32x4xbf16> to vector<32x4xbf16>
    %cst_19 = arith.constant dense<0.000000e+00> : vector<32x256xf32>
    %32 = tpu.matmul %31, %29, %cst_19 {dimension_numbers = #tpu.dot_dimension_numbers<[1], [0], [0], [1], [0, 0, 1, 1], [], []>} : vector<32x4xbf16>, vector<4x256xbf16>, vector<32x256xf32> -> vector<32x256xf32>
    %33 = arith.addf %22, %32 : vector<32x256xf32>
    %34 = vector.extract_strided_slice %1 {offsets = [0, 255], sizes = [4, 1], strides = [1, 1]} : vector<4x256xbf16> to vector<4x1xbf16>
    %35 = vector.extract_strided_slice %1 {offsets = [0, 0], sizes = [4, 255], strides = [1, 1]} : vector<4x256xbf16> to vector<4x255xbf16>
    %36 = tpu.concatenate %34, %35 in 1 : vector<4x1xbf16>, vector<4x255xbf16> -> vector<4x256xbf16>
    %c3 = arith.constant 3 : index
    %c0_20 = arith.constant 0 : index
    %c0_21 = arith.constant 0 : index
    %37 = vector.load %arg3[%c3, %c0_20, %c0_21] : memref<9x1x256xbf16, #tpu.memory_space<vmem>>, vector<1x1x256xbf16>
    %38 = vector.shape_cast %37 : vector<1x1x256xbf16> to vector<1x256xbf16>
    %39 = vector.broadcast %38 : vector<1x256xbf16> to vector<4x256xbf16>
    %40 = arith.mulf %36, %39 : vector<4x256xbf16>
    %c3_22 = arith.constant 3 : index
    %c0_23 = arith.constant 0 : index
    %c0_24 = arith.constant 0 : index
    %41 = vector.load %arg2[%c3_22, %c0_23, %c0_24] : memref<9x32x4xbf16, #tpu.memory_space<vmem>>, vector<1x32x4xbf16>
    %42 = vector.shape_cast %41 : vector<1x32x4xbf16> to vector<32x4xbf16>
    %cst_25 = arith.constant dense<0.000000e+00> : vector<32x256xf32>
    %43 = tpu.matmul %42, %40, %cst_25 {dimension_numbers = #tpu.dot_dimension_numbers<[1], [0], [0], [1], [0, 0, 1, 1], [], []>} : vector<32x4xbf16>, vector<4x256xbf16>, vector<32x256xf32> -> vector<32x256xf32>
    %44 = arith.addf %33, %43 : vector<32x256xf32>
    %c4 = arith.constant 4 : index
    %c0_26 = arith.constant 0 : index
    %c0_27 = arith.constant 0 : index
    %45 = vector.load %arg3[%c4, %c0_26, %c0_27] : memref<9x1x256xbf16, #tpu.memory_space<vmem>>, vector<1x1x256xbf16>
    %46 = vector.shape_cast %45 : vector<1x1x256xbf16> to vector<1x256xbf16>
    %47 = vector.broadcast %46 : vector<1x256xbf16> to vector<4x256xbf16>
    %48 = arith.mulf %1, %47 : vector<4x256xbf16>
    %c4_28 = arith.constant 4 : index
    %c0_29 = arith.constant 0 : index
    %c0_30 = arith.constant 0 : index
    %49 = vector.load %arg2[%c4_28, %c0_29, %c0_30] : memref<9x32x4xbf16, #tpu.memory_space<vmem>>, vector<1x32x4xbf16>
    %50 = vector.shape_cast %49 : vector<1x32x4xbf16> to vector<32x4xbf16>
    %cst_31 = arith.constant dense<0.000000e+00> : vector<32x256xf32>
    %51 = tpu.matmul %50, %48, %cst_31 {dimension_numbers = #tpu.dot_dimension_numbers<[1], [0], [0], [1], [0, 0, 1, 1], [], []>} : vector<32x4xbf16>, vector<4x256xbf16>, vector<32x256xf32> -> vector<32x256xf32>
    %52 = arith.addf %44, %51 : vector<32x256xf32>
    %53 = vector.extract_strided_slice %1 {offsets = [0, 1], sizes = [4, 255], strides = [1, 1]} : vector<4x256xbf16> to vector<4x255xbf16>
    %54 = vector.extract_strided_slice %1 {offsets = [0, 0], sizes = [4, 1], strides = [1, 1]} : vector<4x256xbf16> to vector<4x1xbf16>
    %55 = tpu.concatenate %53, %54 in 1 : vector<4x255xbf16>, vector<4x1xbf16> -> vector<4x256xbf16>
    %c5 = arith.constant 5 : index
    %c0_32 = arith.constant 0 : index
    %c0_33 = arith.constant 0 : index
    %56 = vector.load %arg3[%c5, %c0_32, %c0_33] : memref<9x1x256xbf16, #tpu.memory_space<vmem>>, vector<1x1x256xbf16>
    %57 = vector.shape_cast %56 : vector<1x1x256xbf16> to vector<1x256xbf16>
    %58 = vector.broadcast %57 : vector<1x256xbf16> to vector<4x256xbf16>
    %59 = arith.mulf %55, %58 : vector<4x256xbf16>
    %c5_34 = arith.constant 5 : index
    %c0_35 = arith.constant 0 : index
    %c0_36 = arith.constant 0 : index
    %60 = vector.load %arg2[%c5_34, %c0_35, %c0_36] : memref<9x32x4xbf16, #tpu.memory_space<vmem>>, vector<1x32x4xbf16>
    %61 = vector.shape_cast %60 : vector<1x32x4xbf16> to vector<32x4xbf16>
    %cst_37 = arith.constant dense<0.000000e+00> : vector<32x256xf32>
    %62 = tpu.matmul %61, %59, %cst_37 {dimension_numbers = #tpu.dot_dimension_numbers<[1], [0], [0], [1], [0, 0, 1, 1], [], []>} : vector<32x4xbf16>, vector<4x256xbf16>, vector<32x256xf32> -> vector<32x256xf32>
    %63 = arith.addf %52, %62 : vector<32x256xf32>
    %64 = vector.extract_strided_slice %1 {offsets = [0, 15], sizes = [4, 241], strides = [1, 1]} : vector<4x256xbf16> to vector<4x241xbf16>
    %65 = vector.extract_strided_slice %1 {offsets = [0, 0], sizes = [4, 15], strides = [1, 1]} : vector<4x256xbf16> to vector<4x15xbf16>
    %66 = tpu.concatenate %64, %65 in 1 : vector<4x241xbf16>, vector<4x15xbf16> -> vector<4x256xbf16>
    %c6 = arith.constant 6 : index
    %c0_38 = arith.constant 0 : index
    %c0_39 = arith.constant 0 : index
    %67 = vector.load %arg3[%c6, %c0_38, %c0_39] : memref<9x1x256xbf16, #tpu.memory_space<vmem>>, vector<1x1x256xbf16>
    %68 = vector.shape_cast %67 : vector<1x1x256xbf16> to vector<1x256xbf16>
    %69 = vector.broadcast %68 : vector<1x256xbf16> to vector<4x256xbf16>
    %70 = arith.mulf %66, %69 : vector<4x256xbf16>
    %c6_40 = arith.constant 6 : index
    %c0_41 = arith.constant 0 : index
    %c0_42 = arith.constant 0 : index
    %71 = vector.load %arg2[%c6_40, %c0_41, %c0_42] : memref<9x32x4xbf16, #tpu.memory_space<vmem>>, vector<1x32x4xbf16>
    %72 = vector.shape_cast %71 : vector<1x32x4xbf16> to vector<32x4xbf16>
    %cst_43 = arith.constant dense<0.000000e+00> : vector<32x256xf32>
    %73 = tpu.matmul %72, %70, %cst_43 {dimension_numbers = #tpu.dot_dimension_numbers<[1], [0], [0], [1], [0, 0, 1, 1], [], []>} : vector<32x4xbf16>, vector<4x256xbf16>, vector<32x256xf32> -> vector<32x256xf32>
    %74 = arith.addf %63, %73 : vector<32x256xf32>
    %75 = vector.extract_strided_slice %1 {offsets = [0, 16], sizes = [4, 240], strides = [1, 1]} : vector<4x256xbf16> to vector<4x240xbf16>
    %76 = vector.extract_strided_slice %1 {offsets = [0, 0], sizes = [4, 16], strides = [1, 1]} : vector<4x256xbf16> to vector<4x16xbf16>
    %77 = tpu.concatenate %75, %76 in 1 : vector<4x240xbf16>, vector<4x16xbf16> -> vector<4x256xbf16>
    %c7 = arith.constant 7 : index
    %c0_44 = arith.constant 0 : index
    %c0_45 = arith.constant 0 : index
    %78 = vector.load %arg3[%c7, %c0_44, %c0_45] : memref<9x1x256xbf16, #tpu.memory_space<vmem>>, vector<1x1x256xbf16>
    %79 = vector.shape_cast %78 : vector<1x1x256xbf16> to vector<1x256xbf16>
    %80 = vector.broadcast %79 : vector<1x256xbf16> to vector<4x256xbf16>
    %81 = arith.mulf %77, %80 : vector<4x256xbf16>
    %c7_46 = arith.constant 7 : index
    %c0_47 = arith.constant 0 : index
    %c0_48 = arith.constant 0 : index
    %82 = vector.load %arg2[%c7_46, %c0_47, %c0_48] : memref<9x32x4xbf16, #tpu.memory_space<vmem>>, vector<1x32x4xbf16>
    %83 = vector.shape_cast %82 : vector<1x32x4xbf16> to vector<32x4xbf16>
    %cst_49 = arith.constant dense<0.000000e+00> : vector<32x256xf32>
    %84 = tpu.matmul %83, %81, %cst_49 {dimension_numbers = #tpu.dot_dimension_numbers<[1], [0], [0], [1], [0, 0, 1, 1], [], []>} : vector<32x4xbf16>, vector<4x256xbf16>, vector<32x256xf32> -> vector<32x256xf32>
    %85 = arith.addf %74, %84 : vector<32x256xf32>
    %86 = vector.extract_strided_slice %1 {offsets = [0, 17], sizes = [4, 239], strides = [1, 1]} : vector<4x256xbf16> to vector<4x239xbf16>
    %87 = vector.extract_strided_slice %1 {offsets = [0, 0], sizes = [4, 17], strides = [1, 1]} : vector<4x256xbf16> to vector<4x17xbf16>
    %88 = tpu.concatenate %86, %87 in 1 : vector<4x239xbf16>, vector<4x17xbf16> -> vector<4x256xbf16>
    %c8 = arith.constant 8 : index
    %c0_50 = arith.constant 0 : index
    %c0_51 = arith.constant 0 : index
    %89 = vector.load %arg3[%c8, %c0_50, %c0_51] : memref<9x1x256xbf16, #tpu.memory_space<vmem>>, vector<1x1x256xbf16>
    %90 = vector.shape_cast %89 : vector<1x1x256xbf16> to vector<1x256xbf16>
    %91 = vector.broadcast %90 : vector<1x256xbf16> to vector<4x256xbf16>
    %92 = arith.mulf %88, %91 : vector<4x256xbf16>
    %c8_52 = arith.constant 8 : index
    %c0_53 = arith.constant 0 : index
    %c0_54 = arith.constant 0 : index
    %93 = vector.load %arg2[%c8_52, %c0_53, %c0_54] : memref<9x32x4xbf16, #tpu.memory_space<vmem>>, vector<1x32x4xbf16>
    %94 = vector.shape_cast %93 : vector<1x32x4xbf16> to vector<32x4xbf16>
    %cst_55 = arith.constant dense<0.000000e+00> : vector<32x256xf32>
    %95 = tpu.matmul %94, %92, %cst_55 {dimension_numbers = #tpu.dot_dimension_numbers<[1], [0], [0], [1], [0, 0, 1, 1], [], []>} : vector<32x4xbf16>, vector<4x256xbf16>, vector<32x256xf32> -> vector<32x256xf32>
    %96 = arith.addf %85, %95 : vector<32x256xf32>
    %c0_56 = arith.constant 0 : index
    %c0_57 = arith.constant 0 : index
    %97 = vector.load %arg4[%c0_56, %c0_57] : memref<32x1xf32, #tpu.memory_space<vmem>>, vector<32x1xf32>
    %98 = vector.broadcast %97 : vector<32x1xf32> to vector<32x256xf32>
    %99 = arith.addf %96, %98 : vector<32x256xf32>
    %cst_58 = arith.constant 0.000000e+00 : f32
    %100 = vector.broadcast %cst_58 : f32 to vector<32x256xf32>
    %101 = arith.maximumf %99, %100 : vector<32x256xf32>
    %c0_59 = arith.constant 0 : index
    %c0_60 = arith.constant 0 : index
    %102 = vector.load %arg5[%c0_59, %c0_60] : memref<1x256xf32, #tpu.memory_space<vmem>>, vector<1x256xf32>
    %103 = vector.broadcast %102 : vector<1x256xf32> to vector<32x256xf32>
    %104 = arith.mulf %101, %103 : vector<32x256xf32>
    %cst_61 = arith.constant dense<0.000000e+00> : vector<32xf32>
    %105 = vector.multi_reduction <add>, %104, %cst_61 [1] : vector<32x256xf32> to vector<32xf32>
    %106 = vector.shape_cast %105 : vector<32xf32> to vector<32x1xf32>
    %c0_62 = arith.constant 0 : index
    %c0_63 = arith.constant 0 : index
    %107 = vector.load %arg6[%c0_62, %c0_63] : memref<32x128xf32, #tpu.memory_space<vmem>>, vector<32x128xf32>
    %cst_64 = arith.constant dense<0.000000e+00> : vector<1x128xf32>
    %108 = tpu.matmul %106, %107, %cst_64 {dimension_numbers = #tpu.dot_dimension_numbers<[0], [0], [1], [1], [0, 1, 1, 1], [], []>} : vector<32x1xf32>, vector<32x128xf32>, vector<1x128xf32> -> vector<1x128xf32>
    %c0_65 = arith.constant 0 : index
    %c0_66 = arith.constant 0 : index
    %109 = vector.load %arg7[%c0_65, %c0_66] : memref<1x128xf32, #tpu.memory_space<vmem>>, vector<1x128xf32>
    %110 = arith.addf %108, %109 : vector<1x128xf32>
    %c0_67 = arith.constant 0 : index
    %c0_68 = arith.constant 0 : index
    %c0_69 = arith.constant 0 : index
    %111 = vector.load %arg8[%c0_67, %c0_68, %c0_69] : memref<1x1x128xf32, #tpu.memory_space<vmem>>, vector<1x1x128xf32>
    %112 = vector.shape_cast %111 : vector<1x1x128xf32> to vector<1x128xf32>
    %113 = vector.shape_cast %110 : vector<1x128xf32> to vector<1x1x128xf32>
    tpu.vector_store %arg8[%c0_67, %c0_68, %c0_69], %113 {strides = array<i32>} : memref<1x1x128xf32, #tpu.memory_space<vmem>>, vector<1x1x128xf32>,
    return
  }
  func.func @transform_0(%arg0: i32) -> (i32, i32, i32) {
    %c0_i32 = arith.constant 0 : i32
    %c0_i32_0 = arith.constant 0 : i32
    %c0_i32_1 = arith.constant 0 : i32
    return %arg0, %c0_i32, %c0_i32_0 : i32, i32, i32
  }
  func.func @transform_1(%arg0: i32) -> (i32, i32, i32) {
    %c0_i32 = arith.constant 0 : i32
    %c0_i32_0 = arith.constant 0 : i32
    %c0_i32_1 = arith.constant 0 : i32
    %c0_i32_2 = arith.constant 0 : i32
    return %c0_i32, %c0_i32_0, %c0_i32_1 : i32, i32, i32
  }
  func.func @transform_2(%arg0: i32) -> (i32, i32, i32) {
    %c0_i32 = arith.constant 0 : i32
    %c0_i32_0 = arith.constant 0 : i32
    %c0_i32_1 = arith.constant 0 : i32
    %c0_i32_2 = arith.constant 0 : i32
    return %c0_i32, %c0_i32_0, %c0_i32_1 : i32, i32, i32
  }
  func.func @transform_3(%arg0: i32) -> (i32, i32) {
    %c0_i32 = arith.constant 0 : i32
    %c0_i32_0 = arith.constant 0 : i32
    %c0_i32_1 = arith.constant 0 : i32
    return %c0_i32, %c0_i32_0 : i32, i32
  }
  func.func @transform_4(%arg0: i32) -> (i32, i32) {
    %c0_i32 = arith.constant 0 : i32
    %c0_i32_0 = arith.constant 0 : i32
    %c0_i32_1 = arith.constant 0 : i32
    return %c0_i32, %c0_i32_0 : i32, i32
  }
  func.func @transform_5(%arg0: i32) -> (i32, i32) {
    %c0_i32 = arith.constant 0 : i32
    %c0_i32_0 = arith.constant 0 : i32
    %c0_i32_1 = arith.constant 0 : i32
    return %c0_i32, %c0_i32_0 : i32, i32
  }
  func.func @transform_6(%arg0: i32) -> (i32, i32) {
    %c0_i32 = arith.constant 0 : i32
    %c0_i32_0 = arith.constant 0 : i32
    %c0_i32_1 = arith.constant 0 : i32
    return %c0_i32, %c0_i32_0 : i32, i32
  }
  func.func @transform_7(%arg0: i32) -> (i32, i32, i32) {
    %c0_i32 = arith.constant 0 : i32
    %c0_i32_0 = arith.constant 0 : i32
    %c0_i32_1 = arith.constant 0 : i32
    return %arg0, %c0_i32, %c0_i32_0 : i32, i32, i32
  }
}

</mosaic_0001>

<bundles_post_ra>
// kernel: tpu_custom_call.1
= control target key start
LH: loop header
LB: loop body
LE: loop exit
PB: predicated region body
PF: predicated region fallthrough
CT: control target
= control target key end

     0   :  { %12 = vsyncpa [#allocation3], 0  ;;  %s2522_s0 = inlined_call_operand.vmem [shape: bf16[2,4,256], index: 0, kind: input, shape index: {}]   ;;  %s2523_s1 = inlined_call_operand.vmem [shape: bf16[9,32,4], index: 1, kind: input, shape index: {}]   ;;  %s2524_s2 = inlined_call_operand.vmem [shape: bf16[9,1,256], index: 2, kind: input, shape index: {}]   ;;  %s2525_s3 = inlined_call_operand.vmem [shape: f32[32,1], index: 3, kind: input, shape index: {}]   ;;  %s2526_s4 = inlined_call_operand.vmem [shape: f32[1,256], index: 4, kind: input, shape index: {}]   ;;  %s2527_s5 = inlined_call_operand.vmem [shape: f32[32,128], index: 5, kind: input, shape index: {}]   ;;  %s2528_s6 = inlined_call_operand.vmem [shape: f32[1,128], index: 6, kind: input, shape index: {}]   ;;  %s2529_s7 = inlined_call_operand.hbm [shape: f32[2,1,128], index: 7, kind: output, shape index: {}]  }
   0x1   :  { %14 = vsyncpa [#allocation3 + $0x1], 0  ;;  %s2184_s24 = smov 0   ;;  %s2186_s25 = smov 0  }
   0x2   :  { %s2188_s26 = smov 0   ;;  %s2190_s27 = smov 0  }
   0x3 LB: > { %s2205_s28 = sadd.s32 4294967295, %s2127_s27   ;;  %s1799_s29 = sadd.s32 4294967294, %s2127_s27   ;;  %s2127_s27 = sphi %s2190_s27, %s2535_s27   ;;  %s2123_s26 = sphi %s2188_s26, %s2534_s26   ;;  %s2119_s25 = sphi %s2186_s25, %s2533_s25   ;;  %s2115_s24 = sphi %s2184_s24, %s2532_s24  }
   0x4   : > { %s2209_s30 = sadd.s32 1, %s2127_s27   ;;  %s179_s8 = sadd.s32 1, %s2123_s26 }
   0x5   : > { %s176_s9 = ssub.s32 %s2127_s27, %s2209_s30  ;;  %p189_p0 = scmp.ne.s32.totalorder %s2123_s26, %s2119_s25 }
   0x6   : > { %p177_p1 = scmp.eq.s32.totalorder %s176_s9, 0  ;;  %p190_p2 = scmp.eq.s32.totalorder %s2205_s28, 1 }
   0x7   : > { %p195_p3 = scmp.ne.s32.totalorder %s2119_s25, %s2115_s24  ;;  %p196_p4 = scmp.eq.s32.totalorder %s1799_s29, 1 }
   0x8   : > { %s2220_s10 = scalar_select %p177_p1, %s2123_s26, %s179_s8  }
   0x9   : > { %p2222_p5 = por %p190_p2, %p189_p0  ;;  %p2226_p6 = por %p196_p4, %p195_p3 }
   0xa   : > { %p1802_p7 = scmp.ge.s32.totalorder %s2127_s27, 1  ;;  %p240_p8 = scmp.lt.s32.totalorder %s2127_s27, 3 }
   0xc   : > { %p241_p9 = pnand %p1802_p7, %p240_p8 }
   0xd   : > { %p271_p10 = scmp.lt.s32.totalorder (!%p241_p9), %s2205_s28, 1  ;;  %v282_v0 = vlaneseq (!%p241_p9)  ;;  %v2129_v1 = vmov (!%p241_p9), 1983009808   ;;  %v2130_v3 = vmov (!%p241_p9), 1966171168   ;;  %v2131_v7 = vmov (!%p241_p9), 0  }
   0xe   : > { %244 = sbr.rel (%p241_p9) target bundleno = 938 (0x3aa), region = 48  ;;  %v280_v2 = vunpack.c.l.s4 (!%p241_p9), %v2129_v1  ;;  %v310_v4 = vunpack.c.l.s4 (!%p241_p9), %v2130_v3  ;;  %v1845_v6 = vld.sshfl [vmem:[%s2524_s2 + $0x8] sm:$0x11 pattern:$0x75316420] (!%p241_p9)  ;;  %954 = vmatprep.mubr.bf16.mxu0 (!%p241_p9), %v2131_v7  ;;  %457 = vmatprep.mubr.bf16.mxu1 (!%p241_p9), %v2131_v7  ;;  %s2132_s20 = smov (!%p241_p9), 127  }
   0xf   : > { %v2234_v5 = vshrl.u32 (!%p241_p9), %v282_v0, 7  ;;  %v845_v10 = vcombine.high (!%p241_p9), %v1845_v6, %v1845_v6  ;;  %2045 = vset.pattern.permute.xlu0 (!%p241_p9), %v2131_v7  ;;  %2046 = vset.pattern.permute.xlu1 (!%p241_p9), %v2131_v7  ;;  %s2133_s21 = smov (!%p241_p9), 16   ;;  %s2134_s22 = smov (!%p241_p9), 17   ;;  %vm418_vm0 = vcmask (!%p241_p9), 1041408   ;;  %v2047_v29 = vld [vmem:[%s2523_s1 + $0x40] sm:$0xff] (!%p241_p9)   ;;  %vm411_vm1 = vcmask (!%p241_p9), 31744  }
  0x10   : > { %v281_v8 = vunpack.c.0.s8 (!%p241_p9), %v280_v2  ;;  %v311_v9 = vunpack.c.0.s8 (!%p241_p9), %v310_v4  ;;  %s2135_s23 = smov (!%p241_p9), 113   ;;  %s2136_s9 = smov (!%p241_p9), 15   ;;  %v1547_v30 = vld [vmem:[%s2525_s3] sm:$0xff] (!%p241_p9)  ;;  %v1548_v31 = vld [vmem:[%s2525_s3 + $0x8] sm:$0xff] (!%p241_p9)  ;;  %v1550_v32 = vld [vmem:[%s2525_s3 + $0x18] sm:$0xff] (!%p241_p9)  ;;  %vm987_vm2 = vcmask (!%p241_p9), 1039360  }
  0x11   : > { %v2251_v15 = vsub.s32 (!%p241_p9), 0, %v2234_v5  ;;  %s2138_s14 = smov (!%p241_p9), 1   ;;  %s2139_s15 = smov (!%p241_p9), 111   ;;  %v1549_v33 = vld [vmem:[%s2525_s3 + $0x10] sm:$0xff] (!%p241_p9)  ;;  %vm347_vm3 = vcmask (!%p241_p9), 130048   ;;  %vm291_vm4 = vcmask (!%p241_p9), 138240  }
  0x12   : > { %v284_v11 = vsub.s32 (!%p241_p9), %v281_v8, %v2234_v5  ;;  %v2248_v12 = vsub.s32 (!%p241_p9), %v311_v9, %v2234_v5  ;;  %v1856_v34 = vld.sshfl [vmem:[%s2524_s2 + $0xa] sm:$0x11 pattern:$0x75316420] (!%p241_p9)  ;;  %vm1128_vm5 = vcmask (!%p241_p9), 924672   ;;  %vm557_vm6 = vcmask (!%p241_p9), 121856  }
  0x13   : > { %v1807_v35 = vld.sshfl [vmem:[%s2524_s2 + $0x2] sm:$0x11 pattern:$0x75316420] (!%p241_p9)  ;;  %v1005_v36 = vcombine.high (!%p241_p9), %v1856_v34, %v1856_v34  ;;  %vm1269_vm7 = vcmask (!%p241_p9), 916480   ;;  %vm698_vm8 = vcmask (!%p241_p9), 7168  }
  0x14   : > { %v852_v16 = vrot.slane (!%p241_p9), %v1845_v6, %v2248_v12  ;;  %v859_v17 = vrot.slane (!%p241_p9), %v845_v10, %v2248_v12  ;;  %v365_v37 = vcombine.high (!%p241_p9), %v1807_v35, %v1807_v35  ;;  %v1805_v38 = vld.sshfl [vmem:[%s2524_s2] sm:$0x11 pattern:$0x75316420] (!%p241_p9)  ;;  %v1012_v39 = vrot.slane (!%p241_p9), %v1856_v34, %v2248_v12  ;;  %s1900_s17 = sshll.u32 (!%p241_p9), %s2205_s28, 4 }
  0x15   : > { %s272_s13 = scalar_select %p271_p10, %s2205_s28, 1  ;;  %v1019_v40 = vrot.slane %v1005_v36, %v2248_v12  ;;  %v308_v41 = vcombine.high %v1805_v38, %v1805_v38  ;;  %v372_v43 = vrot.slane %v1807_v35, %v2248_v12  ;;  %v1867_v44 = vld.sshfl [vmem:[%s2524_s2 + $0xc] sm:$0x11 pattern:$0x75316420]  ;;  %v315_v45 = vrot.slane %v1805_v38, %v2248_v12 }
  0x16   : > { %v861_v19 = vpack.i.b16 %v852_v16, %v852_v16  ;;  %v868_v20 = vpack.i.b16 %v859_v17, %v859_v17  ;;  %v379_v42 = vrot.slane %v365_v37, %v2248_v12  ;;  %v1021_v46 = vpack.i.b16 %v1012_v39, %v1012_v39  ;;  %v1823_v50 = vld.sshfl [vmem:[%s2524_s2 + $0x4] sm:$0x11 pattern:$0x75316420]  ;;  %s2143_s28 = smov [#allocation2]  }
  0x17   : > { %s1903_s16 = sshll.u32 %s272_s13, 2  ;;  %s2137_s13 = smov 112   ;;  %v1028_v47 = vpack.i.b16 %v1019_v40, %v1019_v40  ;;  %v322_v48 = vrot.slane %v308_v41, %v2248_v12  ;;  %v1146_v49 = vcombine.high %v1867_v44, %v1867_v44  ;;  %v381_v53 = vpack.i.b16 %v372_v43, %v372_v43  ;;  %v1878_v4 = vld.sshfl [vmem:[%s2524_s2 + $0xe] sm:$0x11 pattern:$0x75316420] }
  0x18   : > { %s275_s19 = scalar_lea.vmem %s2522_s0, %s1903_s16  ;;  %v866_v21 = vrot.slane %v861_v19, %v2251_v15  ;;  %v873_v22 = vrot.slane %v868_v20, %v2251_v15  ;;  %v388_v52 = vpack.i.b16 %v379_v42, %v379_v42  ;;  %v324_v54 = vpack.i.b16 %v315_v45, %v315_v45  ;;  %v1889_v42 = vld.sshfl [vmem:[%s2524_s2 + $0x10] sm:$0x11 pattern:$0x75316420]  ;;  %s2069_s8 = sshll.u32 %s2143_s28, 4  ;;  %s2070_s8 = int_to_ptr.vmem [resolvable:$false] %s2069_s8 }
  0x19   : > { %v277_v13 = vld [vmem:[%s275_s19] sm:$0xf]  ;;  %v1026_v56 = vrot.slane %v1021_v46, %v2251_v15  ;;  %v1033_v57 = vrot.slane %v1028_v47, %v2251_v15  ;;  %v1153_v58 = vrot.slane %v1867_v44, %v2248_v12  ;;  %v575_v59 = vcombine.high %v1823_v50, %v1823_v50 }
  0x1a   : > { %v285_v14 = vrot.slane %v277_v13, %v284_v11  ;;  %v876_v23 = vcombine.low %v866_v21, %v873_v22  ;;  %v331_v60 = vpack.i.b16 %v322_v48, %v322_v48  ;;  %v1160_v61 = vrot.slane %v1146_v49, %v2248_v12  ;;  %v2048_v22 = vld [vmem:[%s2523_s1 + $0x50] sm:$0xff]  }
  0x1b   : > { %v393_v63 = vrot.slane %v388_v52, %v2251_v15  ;;  %v386_v0 = vrot.slane %v381_v53, %v2251_v15  ;;  %v329_v3 = vrot.slane %v324_v54, %v2251_v15  ;;  %v1162_v10 = vpack.i.b16 %v1153_v58, %v1153_v58 }
  0x1c   : > { %983 = vrot.lane.b32.xlu1 %v285_v14, %s2132_s20  ;;  %v286_v18 = vcombine.high %v285_v14, %v285_v14  ;;  %v883_v24 = vrot.slane %v876_v23, %v284_v11  ;;  %v336_v16 = vrot.slane %v331_v60, %v2251_v15  ;;  %v1169_v17 = vpack.i.b16 %v1160_v61, %v1160_v61 }
  0x1d   : > { %v1287_v23 = vcombine.high %v1878_v4, %v1878_v4  ;;  %v1167_v35 = vrot.slane %v1162_v10, %v2251_v15  ;;  %vm1410_vm9 = vcmask 908288   ;;  %vm2141_vm10 = vmmov 0  }
  0x1e   : > { %343 = vrot.lane.b32.xlu0 %v286_v18, %s2133_s21  ;;  %v885_v25 = vmul.bf16 %v883_v24, %v277_v13  ;;  %v2323_v24 = vld.sshfl [vmem:[%s2524_s2 + $0x6] sm:$0x11 pattern:$0x75316420]  ;;  %v1174_v40 = vrot.slane %v1169_v17, %v2251_v15  ;;  %vm1656_vm11 = vcmask 261120  }
  0x1f   : > { %v716_v36 = vcombine.high %v2323_v24, %v2323_v24  ;;  %v1301_v41 = vrot.slane %v1287_v23, %v2248_v12  ;;  %v723_v23 = vrot.slane %v2323_v24, %v2248_v12  ;;  %v2054_v24 = vld [vmem:[%s2523_s1 + $0x68] sm:$0xff]  }
  0x20   : > { %985 = vrot.lane.b32.xlu1 %v286_v18, %s2132_s20  ;;  %v908_v26 = vrot.slane %v885_v25, %v284_v11  ;;  %v589_v11 = vrot.slane %v575_v59, %v2248_v12 }
  0x22   : > { %345 = vrot.lane.b32.xlu0 %v285_v14, %s2133_s21  ;;  %v2257_v27 = vcombine.high %v908_v26, %v908_v26  ;;  %v2260_v28 = vsel %vm418_vm0, %v908_v26, 0 }
  0x24   : > { %289 = vrot.lane.b32.xlu1 %v285_v14, %s2134_s22  ;;  %1852 = vmatprep.subr.msk.bf16.mxu0 %vm418_vm0, %v2257_v27 }
  0x25   : > { %923 = vmatpush1.bf16.msra.mxu0 %v2260_v28 }
  0x26   : > { %287 = vrot.lane.b32.xlu0 %v286_v18, %s2134_s22  ;;  %s2480_s22 = scalar_lea.hbm %s2529_s7, %s1900_s17 }
  0x28   : > { %1126 = vrot.lane.b32.xlu1 %v286_v18, %s2135_s23  ;;  %1853 = vmatmul.mubr.msk.bf16.vlgmr.msra.gmra.mrb[0].mxu0 %vm411_vm1, %v2047_v29  ;;  %v2049_v29 = vld [vmem:[%s2523_s1 + $0x10] sm:$0xff]  }
  0x29   : > { %1095 = vmatprep.mubr.bf16.mxu0 %v2131_v7 }
  0x2a   : > { %1124 = vrot.lane.b32.xlu0 %v285_v14, %s2135_s23 }
  0x2c   : > { %555 = vrot.lane.b32.xlu1 %v285_v14, %s2136_s9 }
  0x2e   : > { %553 = vrot.lane.b32.xlu0 %v286_v18, %s2136_s9  ;;  %s2071_s9 = scalar_lea.vmem %s2070_s8, 32 }
  0x30   : > { %1267 = vrot.lane.b32.xlu1 %v286_v18, %s2137_s13 }
  0x32   : > { %1265 = vrot.lane.b32.xlu0 %v285_v14, %s2137_s13 }
  0x34   : > { %696 = vrot.lane.b32.xlu1 %v285_v14, %s2138_s14 }
  0x36   : > { %694 = vrot.lane.b32.xlu0 %v286_v18, %s2138_s14  ;;  %s269_s14 = sand.u32 1, %s2119_s25  }
  0x37   : > { %s270_s18 = scalar_lea.vmem [#allocation2], %s269_s14  ;;  %s1732_s23 = scalar_lea.sflag [#allocation3], %s269_s14 }
  0x38   : > { %1408 = vrot.lane.b32.xlu1 %v286_v18, %s2139_s15  ;;  %s1744_s19 = sshll.u32 %s270_s18, 4  ;;  %s2482_s19 = int_to_ptr.vmem [resolvable:$true] %s1744_s19 }
  0x39   : > { %s2065_s29 = scalar_lea.vmem %s2482_s19, 16  ;;  %p2072_p0 = scmp.lt.s32.totalorder %s2482_s19, %s2070_s8 }
  0x3a   : > { %1406 = vrot.lane.b32.xlu0 %v285_v14, %s2139_s15  ;;  %p2066_p11 = scmp.ne.s32.totalorder %s2482_s19, %s2065_s29  ;;  %p2073_p1 = scmp.lt.s32.totalorder %s2071_s9, %s2065_s29 }
  0x3c   : > { %1558 = vperm.xlu1 %2046, %v1548_v31   ;;  %v598_v31 = vpack.i.b16 %v589_v11, %v589_v11  ;;  %p2067_p12 = pnand %p2066_p11, %p2222_p5  ;;  %p2074_p2 = por %p2073_p1, %p2072_p0 }
  0x3e   : > { %1553 = vperm.xlu0 %2045, %v1547_v30   ;;  %v582_v30 = vrot.slane %v1823_v50, %v2248_v12  ;;  %v603_v46 = vrot.slane %v598_v31, %v2251_v15  ;;  %v730_v50 = vrot.slane %v716_v36, %v2248_v12  ;;  %v2055_v36 = vld [vmem:[%s2523_s1 + $0x8] sm:$0xff]   ;;  %p2068_p13 = pneg %p2067_p12 }
  0x40   : > { %1563 = vperm.xlu1 %2046, %v1549_v33   ;;  %v591_v45 = vpack.i.b16 %v582_v30, %v582_v30  ;;  %p2075_p3 = pnand %p2074_p2, %p2068_p13 }
  0x42   : > { %1568 = vperm.xlu0 %2045, %v1550_v32   ;;  %v1294_v32 = vrot.slane %v1878_v4, %v2248_v12  ;;  %v596_v60 = vrot.slane %v591_v45, %v2251_v15 }
  0x44   : > { %v1303_v47 = vpack.i.b16 %v1294_v32, %v1294_v32 }
  0x8e   : > { %v984_v51 = vpop.permute.xlu1 %983 }
  0x90   : > { %v344_v55 = vpop.permute.xlu0 %343 }
  0x92   : > { %v986_v62 = vpop.permute.xlu1 %985 }
  0x93   : > { %v988_v1 = vsel %vm987_vm2, %v984_v51, %v986_v62  ;;  %v993_v2 = vsel %vm987_vm2, %v986_v62, %v984_v51  ;;  %v2050_v51 = vld [vmem:[%s2523_s1 + $0x58] sm:$0xff]   ;;  %v739_v62 = vpack.i.b16 %v730_v50, %v730_v50  ;;  %v2062_v50 = vld [vmem:[%s2523_s1 + $0x88] sm:$0xff]  }
  0x94   : > { %v1034_v6 = vmul.bf16 %v1026_v56, %v988_v1  ;;  %v1035_v8 = vmul.bf16 %v1033_v57, %v993_v2  ;;  %v346_v9 = vpop.permute.xlu0 %345  ;;  %v1428_v56 = vcombine.high %v1889_v42, %v1889_v42  ;;  %v2051_v57 = vld [vmem:[%s2523_s1 + $0x18] sm:$0xff]   ;;  %v1308_v1 = vrot.slane %v1303_v47, %v2251_v15 }
  0x95   : > { %v348_v13 = vsel %vm347_vm3, %v346_v9, %v344_v55  ;;  %v353_v14 = vsel %vm347_vm3, %v344_v55, %v346_v9  ;;  %v1310_v55 = vpack.i.b16 %v1301_v41, %v1301_v41  ;;  %v744_v10 = vrot.slane %v739_v62, %v2251_v15  ;;  %v2058_v47 = vld [vmem:[%s2523_s1 + $0x78] sm:$0xff]  }
  0x96   : > { %1863 = vmatprep.subr.msk.bf16.mxu0 %vm418_vm0, %v1035_v8  ;;  %v1058_v18 = vsel %vm418_vm0, %v1034_v6, 0  ;;  %v290_v19 = vpop.permute.xlu1 %289  ;;  %v395_v20 = vmul.bf16 %v393_v63, %v348_v13  ;;  %v394_v21 = vmul.bf16 %v386_v0, %v353_v14  ;;  %v2052_v13 = vld [vmem:[%s2523_s1 + $0x60] sm:$0xff]  }
  0x97   : > { %1064 = vmatpush1.bf16.msra.mxu0 %v1058_v18  ;;  %v1315_v2 = vrot.slane %v1310_v55, %v2251_v15 }
  0x98   : > { %1814 = vmatprep.subr.msk.bf16.mxu1 %vm418_vm0, %v395_v20  ;;  %v288_v25 = vpop.permute.xlu0 %287  ;;  %v420_v26 = vsel %vm418_vm0, %v394_v21, 0 }
  0x99   : > { %v292_v33 = vsel %vm291_vm4, %v290_v19, %v288_v25  ;;  %v297_v34 = vsel %vm291_vm4, %v288_v25, %v290_v19  ;;  %426 = vmatpush1.bf16.msra.mxu1 %v420_v26  ;;  %v2053_v19 = vld [vmem:[%s2523_s1] sm:$0xff]  }
  0x9a   : > { %v337_v37 = vmul.bf16 %v329_v3, %v297_v34  ;;  %v338_v38 = vmul.bf16 %v336_v16, %v292_v33  ;;  %1864 = vmatmul.mubr.msk.bf16.vlgmr.msra.gmra.mrb[0].mxu0 %vm411_vm1, %v2048_v22  ;;  %v1127_v39 = vpop.permute.xlu1 %1126  ;;  %v1442_v3 = vrot.slane %v1428_v56, %v2248_v12  ;;  %v1435_v22 = vrot.slane %v1889_v42, %v2248_v12 }
  0x9b   : > { %1105 = vmatprep.mubr.bf16.mxu0 %v2131_v7  ;;  %v732_v34 = vpack.i.b16 %v723_v23, %v723_v23 }
  0x9c   : > { %1815 = vmatmul.mubr.msk.bf16.vlgmr.msra.gmra.mrb[0].mxu1 %vm411_vm1, %v2049_v29  ;;  %1819 = vmatprep.subr.msk.bf16.mxu1 %vm418_vm0, %v338_v38  ;;  %v495_v43 = vsel %vm418_vm0, %v337_v37, 0  ;;  %v1125_v44 = vpop.permute.xlu0 %1124  ;;  %v1451_v18 = vpack.i.b16 %v1442_v3, %v1442_v3  ;;  %v1444_v32 = vpack.i.b16 %v1435_v22, %v1435_v22 }
  0x9d   : > { %501 = vmatpush1.bf16.msra.mxu1 %v495_v43  ;;  %v1129_v48 = vsel %vm1128_vm5, %v1125_v44, %v1127_v39  ;;  %v1134_v49 = vsel %vm1128_vm5, %v1127_v39, %v1125_v44  ;;  %467 = vmatprep.mubr.bf16.mxu1 %v2131_v7  ;;  %v737_v39 = vrot.slane %v732_v34, %v2251_v15  ;;  %v2056_v43 = vld [vmem:[%s2523_s1 + $0x70] sm:$0xff]   ;;  %v2057_v44 = vld [vmem:[%s2523_s1 + $0x20] sm:$0xff]  }
  0x9e   : > { %v1175_v52 = vmul.bf16 %v1167_v35, %v1129_v48  ;;  %v1176_v53 = vmul.bf16 %v1174_v40, %v1134_v49  ;;  %v556_v54 = vpop.permute.xlu1 %555  ;;  %v1456_v31 = vrot.slane %v1451_v18, %v2251_v15  ;;  %v1449_v37 = vrot.slane %v1444_v32, %v2251_v15  ;;  %v2059_v48 = vld [vmem:[%s2523_s1 + $0x28] sm:$0xff]   ;;  %v2060_v49 = vld [vmem:[%s2523_s1 + $0x80] sm:$0xff]  }
  0xa0   : > { %1874 = vmatprep.subr.msk.bf16.mxu0 %vm418_vm0, %v1176_v53  ;;  %v1199_v58 = vsel %vm418_vm0, %v1175_v52, 0  ;;  %v554_v59 = vpop.permute.xlu0 %553 }
  0xa1   : > { %1205 = vmatpush1.bf16.msra.mxu0 %v1199_v58  ;;  %v558_v61 = vsel %vm557_vm6, %v556_v54, %v554_v59  ;;  %v563_v4 = vsel %vm557_vm6, %v554_v59, %v556_v54  ;;  %v1595_v58 = vsub.s32 1, %v2234_v5 }
  0xa2   : > { %1865 = vmatmul.mubr.msk.bf16.gmra.mrb[4].mxu0 %vm411_vm1, %v2050_v51  ;;  %v605_v63 = vmul.bf16 %v603_v46, %v558_v61  ;;  %v1268_v0 = vpop.permute.xlu1 %1267  ;;  %v604_v11 = vmul.bf16 %v596_v60, %v563_v4  ;;  %v2063_v51 = vld [vmem:[%s2523_s1 + $0x38] sm:$0xff]  }
  0xa3   : > { %1236 = vmatprep.mubr.bf16.mxu0 %v2131_v7 }
  0xa4   : > { %1816 = vmatmul.mubr.msk.bf16.gmra.mrb[4].mxu1 %vm411_vm1, %v2051_v57  ;;  %1830 = vmatprep.subr.msk.bf16.mxu1 %vm418_vm0, %v605_v63  ;;  %v1266_v6 = vpop.permute.xlu0 %1265  ;;  %v628_v26 = vsel %vm418_vm0, %v604_v11, 0  ;;  %v1587_v57 = vld [vmem:[%s2526_s4] sm:$0x3] }
  0xa5   : > { %532 = vmatprep.mubr.bf16.mxu1 %v2131_v7  ;;  %v1270_v8 = vsel %vm1269_vm7, %v1266_v6, %v1268_v0  ;;  %v1275_v9 = vsel %vm1269_vm7, %v1268_v0, %v1266_v6  ;;  %v1592_v3 = vrot.slane %v1587_v57, %v2251_v15 }
  0xa6   : > { %v1316_v14 = vmul.bf16 %v1308_v1, %v1270_v8  ;;  %v1317_v16 = vmul.bf16 %v1315_v2, %v1275_v9  ;;  %v697_v17 = vpop.permute.xlu1 %696  ;;  %v1596_v8 = vrot.slane %v1587_v57, %v1595_v58 }
  0xa8   : > { %1885 = vmatprep.subr.msk.bf16.mxu0 %vm418_vm0, %v1317_v16  ;;  %v1340_v20 = vsel %vm418_vm0, %v1316_v14, 0  ;;  %v695_v21 = vpop.permute.xlu0 %694 }
  0xa9   : > { %v699_v25 = vsel %vm698_vm8, %v697_v17, %v695_v21  ;;  %v704_v40 = vsel %vm698_vm8, %v695_v21, %v697_v17 }
  0xaa   : > { %1875 = vmatmul.mubr.msk.bf16.vlgmr.msra.gmra.mrb[0].mxu0 %vm411_vm1, %v2052_v13  ;;  %v746_v29 = vmul.bf16 %v744_v10, %v699_v25  ;;  %v1409_v30 = vpop.permute.xlu1 %1408  ;;  %v745_v42 = vmul.bf16 %v737_v39, %v704_v40 }
  0xab   : > { %1246 = vmatprep.mubr.bf16.mxu0 %v2131_v7  ;;  %1346 = vmatpush1.bf16.msra.mxu0 %v1340_v20 }
  0xac   : > { %1820 = vmatmul.mubr.msk.bf16.vlgmr.msra.gmra.mrb[0].mxu1 %vm411_vm1, %v2053_v19  ;;  %v1407_v33 = vpop.permute.xlu0 %1406  ;;  %v769_v46 = vsel %vm418_vm0, %v745_v42, 0 }
  0xad   : > { %634 = vmatpush1.bf16.msra.mxu1 %v628_v26  ;;  %542 = vmatprep.mubr.bf16.mxu1 %v2131_v7  ;;  %v1416_v12 = vsel %vm1410_vm9, %v1409_v30, %v1407_v33  ;;  %v1411_v38 = vsel %vm1410_vm9, %v1407_v33, %v1409_v30 }
  0xae   : > { %1841 = vmatprep.subr.msk.bf16.mxu1 %vm418_vm0, %v746_v29  ;;  %v1458_v35 = vmul.bf16 %v1456_v31, %v1416_v12  ;;  %v1457_v41 = vmul.bf16 %v1449_v37, %v1411_v38 }
  0xb0   : > { %1896 = vmatprep.subr.msk.bf16.mxu0 %vm418_vm0, %v1458_v35  ;;  %v1481_v45 = vsel %vm418_vm0, %v1457_v41, 0 }
  0xb2   : > { %1876 = vmatmul.mubr.msk.bf16.gmra.mrb[4].mxu0 %vm411_vm1, %v2054_v24 }
  0xb3   : > { %1377 = vmatprep.mubr.bf16.mxu0 %v2131_v7 }
  0xb4   : > { %1821 = vmatmul.mubr.msk.bf16.gmra.mrb[4].mxu1 %vm411_vm1, %v2055_v36 }
  0xb5   : > { %665 = vmatprep.mubr.bf16.mxu1 %v2131_v7 }
  0xba   : > { %1886 = vmatmul.mubr.msk.bf16.vlgmr.msra.gmra.mrb[0].mxu0 %vm411_vm1, %v2056_v43 }
  0xbb   : > { %1387 = vmatprep.mubr.bf16.mxu0 %v2131_v7  ;;  %1487 = vmatpush1.bf16.msra.mxu0 %v1481_v45  ;;  %v1559_v63 = vpop.permute.xlu1 %1558 }
  0xbc   : > { %1831 = vmatmul.mubr.msk.bf16.vlgmr.msra.gmra.mrb[0].mxu1 %vm411_vm1, %v2057_v44 }
  0xbd   : > { %775 = vmatpush1.bf16.msra.mxu1 %v769_v46  ;;  %675 = vmatprep.mubr.bf16.mxu1 %v2131_v7  ;;  %v1554_v54 = vpop.permute.xlu0 %1553 }
  0xbe   : > { %1926 = vmatprep.subr.msk.bf16.mxu1 %vm418_vm0, %v2257_v27  ;;  %v2061_v27 = vld [vmem:[%s2523_s1 + $0x30] sm:$0xff]  }
  0xbf   : > { %v1564_v31 = vpop.permute.xlu1 %1563 }
  0xc1   : > { %v1569_v35 = vpop.permute.xlu0 %1568 }
  0xc2   : > { %1887 = vmatmul.mubr.msk.bf16.gmra.mrb[4].mxu0 %vm411_vm1, %v2058_v47 }
  0xc3   : > { %1518 = vmatprep.mubr.bf16.mxu0 %v2131_v7 }
  0xc4   : > { %1832 = vmatmul.mubr.msk.bf16.gmra.mrb[4].mxu1 %vm411_vm1, %v2059_v48 }
  0xc5   : > { %806 = vmatprep.mubr.bf16.mxu1 %v2131_v7 }
  0xca   : > { %1897 = vmatmul.mubr.msk.bf16.vlgmr.msra.gmra.mrb[0].mxu0 %vm411_vm1, %v2060_v49 }
  0xcb   : > { %1528 = vmatprep.mubr.bf16.mxu0 %v2131_v7 }
  0xcc   : > { %1842 = vmatmul.mubr.msk.bf16.vlgmr.msra.gmra.mrb[0].mxu1 %vm411_vm1, %v2061_v27  ;;  %v1619_v27 = vld [vmem:[%s2527_s5] sm:$0xff] }
  0xcd   : > { %1927 = vmatpush1.bf16.msra.mxu1 %v2260_v28  ;;  %816 = vmatprep.mubr.bf16.mxu1 %v2131_v7  ;;  %v2064_v28 = vld [vmem:[%s2523_s1 + $0x48] sm:$0xff]  }
  0xd2   : > { %1898 = vmatmul.mubr.msk.bf16.gmra.mrb[4].mxu0 %vm411_vm1, %v2062_v50  ;;  %v1620_v50 = vld [vmem:[%s2527_s5 + $0x8] sm:$0xff] }
  0xd4   : > { %1843 = vmatmul.mubr.msk.bf16.gmra.mrb[4].mxu1 %vm411_vm1, %v2063_v51  ;;  %v1621_v51 = vld [vmem:[%s2527_s5 + $0x10] sm:$0xff] }
  0xd5   : > { %964 = vmatprep.mubr.bf16.mxu1 %v2131_v7 }
  0xe0   : > { %1854 = vmatmul.mubr.msk.bf16.vlgmr.msra.gmra.mrb[4].mxu1 %vm411_vm1, %v2064_v28  ;;  %v2140_v28 = vmov 0.0|0.0  }
  0xe1   : > { %1920 = vmatprep.subr.bf16.mxu1 %v2140_v28 }
 0x19d   : > { %v1520_v52 = vpop.f32.mrb[0].mxu0 }
 0x19e   : > { %v1522_v53 = vpop.f32.mrb[1].mxu0 }
 0x19f   : > { %v808_v55 = vpop.f32.mrb[0].mxu1  ;;  %v1524_v56 = vpop.f32.mrb[2].mxu0 }
 0x1a0   : > { %v1928_v59 = vadd.f32 %v1520_v52, %v808_v55  ;;  %v810_v60 = vpop.f32.mrb[1].mxu1  ;;  %v1526_v7 = vpop.f32.mrb[3].mxu0  ;;  %v1921_v52 = vpack.c.bf16 %v1620_v50, %v1619_v27 }
 0x1a1   : > { %v1929_v61 = vadd.f32 %v1522_v53, %v810_v60  ;;  %v812_v62 = vpop.f32.mrb[2].mxu1  ;;  %v1622_v53 = vld [vmem:[%s2527_s5 + $0x18] sm:$0xff] }
 0x1a2   : > { %v1930_v0 = vadd.f32 %v1524_v56, %v812_v62  ;;  %v1571_v1 = vadd.f32 %v1928_v59, %v1554_v54  ;;  %v814_v2 = vpop.f32.mrb[3].mxu1  ;;  %1922 = vmatpush3.bf16.msra.mxu1 %v1921_v52  ;;  %v1924_v55 = vpack.c.bf16 %v1622_v53, %v1621_v51 }
 0x1a3   : > { %v1572_v4 = vadd.f32 %v1929_v61, %v1554_v54  ;;  %v1931_v6 = vadd.f32 %v1526_v7, %v814_v2  ;;  %v2142_v54 = vmov 0.0   ;;  %1923 = vmatprep.subr.bf16.mxu1 %v2140_v28  ;;  %v1623_v7 = vld [vmem:[%s2528_s6] sm:$0x1] }
 0x1a4   : > { %v1579_v9 = vmax.f32 %v1571_v1, 0.0  ;;  %v1573_v10 = vadd.f32 %v1930_v0, %v1559_v63  ;;  %1917 = vmatprep.mubr.msk.f32.mxu1 %vm2141_vm10, %v2142_v54 }
 0x1a5   : > { %v1580_v11 = vmax.f32 %v1572_v4, 0.0  ;;  %v1574_v13 = vadd.f32 %v1931_v6, %v1559_v63  ;;  %v1530_v14 = vpop.f32.mrb[4].mxu0 }
 0x1a6   : > { %v1581_v5 = vmax.f32 %v1573_v10, 0.0  ;;  %v1532_v16 = vpop.f32.mrb[5].mxu0  ;;  %v1599_v17 = vmul.f32 %v1592_v3, %v1579_v9  ;;  %1925 = vmatpush3.bf16.msra.mxu1 %v1924_v55 }
 0x1a7   : > { %v1582_v18 = vmax.f32 %v1574_v13, 0.0  ;;  %v1534_v19 = vpop.f32.mrb[6].mxu0  ;;  %v1600_v20 = vmul.f32 %v1596_v8, %v1580_v11 }
 0x1a8   : > { %v1536_v21 = vpop.f32.mrb[7].mxu0  ;;  %v1601_v22 = vmul.f32 %v1592_v3, %v1581_v5 }
 0x1a9   : > { %v1607_v23 = vadd.f32 %v1600_v20, %v1599_v17  ;;  %v1602_v25 = vmul.f32 %v1596_v8, %v1582_v18 }
 0x1ab   : > { %1608 = vadd.xlane.f32.xlu1 %v1607_v23  ;;  %v1610_v15 = vadd.f32 %v1602_v25, %v1601_v22 }
 0x1ad   : > { %1611 = vadd.xlane.f32.xlu0 %v1610_v15 }
 0x1b3   : > { %v966_v26 = vpop.f32.mrb[4].mxu1 }
 0x1b4   : > { %v1932_v29 = vadd.f32 %v1530_v14, %v966_v26  ;;  %v968_v30 = vpop.f32.mrb[5].mxu1 }
 0x1b5   : > { %v1933_v32 = vadd.f32 %v1532_v16, %v968_v30  ;;  %v970_v33 = vpop.f32.mrb[6].mxu1 }
 0x1b6   : > { %v1575_v12 = vadd.f32 %v1932_v29, %v1564_v31  ;;  %v1934_v24 = vadd.f32 %v1534_v19, %v970_v33  ;;  %v972_v34 = vpop.f32.mrb[7].mxu1 }
 0x1b7   : > { %v1576_v36 = vadd.f32 %v1933_v32, %v1564_v31  ;;  %v1935_v37 = vadd.f32 %v1536_v21, %v972_v34 }
 0x1b8   : > { %v1583_v38 = vmax.f32 %v1575_v12, 0.0  ;;  %v1577_v39 = vadd.f32 %v1934_v24, %v1569_v35 }
 0x1b9   : > { %v1584_v40 = vmax.f32 %v1576_v36, 0.0  ;;  %v1578_v41 = vadd.f32 %v1935_v37, %v1569_v35 }
 0x1ba   : > { %v1585_v42 = vmax.f32 %v1577_v39, 0.0  ;;  %v1603_v43 = vmul.f32 %v1592_v3, %v1583_v38 }
 0x1bb   : > { %v1586_v44 = vmax.f32 %v1578_v41, 0.0  ;;  %v1604_v45 = vmul.f32 %v1596_v8, %v1584_v40 }
 0x1bc   : > { %v1605_v46 = vmul.f32 %v1592_v3, %v1585_v42 }
 0x1bd   : > { %v1613_v47 = vadd.f32 %v1604_v45, %v1603_v43  ;;  %v1606_v48 = vmul.f32 %v1596_v8, %v1586_v44 }
 0x1bf   : > { %1614 = vadd.xlane.f32.xlu0 %v1613_v47  ;;  %v1616_v49 = vadd.f32 %v1606_v48, %v1605_v46 }
 0x1c1   : > { %1617 = vadd.xlane.f32.xlu1 %v1616_v49 }
 0x238   : > { %v1609_v56 = vpop.xlane.xlu1 %1608 }
 0x239   : > { %1624 = vxpose.xlu0.b32.start [1/4] (short) (narrow) %v1609_v56, 8 }
 0x23a   : > { %v1612_v57 = vpop.xlane.xlu0 %1611 }
 0x23d   : > { %1625 = vxpose.xlu0.b32.cont [2/4] (short) (narrow) %v1612_v57, 8 }
 0x24c   : > { %v1615_v58 = vpop.xlane.xlu0 %1614 }
 0x24d   : > { %1626 = vxpose.xlu0.b32.cont [3/4] (short) (narrow) %v1615_v58, 8 }
 0x24e   : > { %v1618_v59 = vpop.xlane.xlu1 %1617 }
 0x251   : > { %1627 = vxpose.xlu0.b32.end [4/4] (short) (narrow) %v1618_v59, 8 }
 0x2c5   : > { %v1640_v60 = vpop.trf.xlu0 }
 0x2c6   : > { %1918 = vmatmul.mubr.msk.f32.vlgmr.msra.gmra.mrb[8].mxu1 %vm1656_vm11, %v1640_v60 }
 0x399   : > { %v1726_v61 = vpop.f32.mrb[8].mxu1 }
 0x39a   : > { %v1727_v62 = vadd.f32 %v1726_v61, %v1623_v7  ;;  %v1919_v63 = vpop.f32.mrb[9].mxu1 }
 0x39c   : > { %1730 = vst [vmem:[%s270_s18] sm:$0x1] %v1727_v62 }
 0x39d   : > { %2078 = shalt.err (!%p2075_p3)
}
 0x39e   : > { %s2079_s13 = scalar_lea.hbm %s2480_s22, 16  ;;  %s2083_s16 = scalar_lea.hbm %s2529_s7, 32 }
 0x39f   : > { %p2080_p4 = scmp.ne.s32.totalorder %s2480_s22, %s2079_s13  ;;  %p2084_p9 = scmp.lt.u32.totalorder %s2480_s22, %s2529_s7 }
 0x3a0   : > { %p2085_p10 = scmp.lt.u32.totalorder %s2083_s16, %s2079_s13  ;;  %p2087_p12 = scmp.lt.u32.totalorder %s2079_s13, %s2480_s22 }
 0x3a1   : > { %p2081_p7 = pnand %p2080_p4, %p2222_p5 }
 0x3a2   : > { %p2086_p11 = por %p2085_p10, %p2084_p9 }
 0x3a3   : > { %p2082_p8 = pneg %p2081_p7 }
 0x3a4   : > { %p2088_p13 = por %p2087_p12, %p2086_p11 }
 0x3a6   : > { %p2089_p0 = pnand %p2088_p13, %p2082_p8 }
 0x3a8   : > { %2092 = shalt.err (!%p2089_p0)
}
 0x3a9   : > { %1992 = dma.vmem_to_hbm [thread:$0]  (%p2222_p5), %s2482_s19, 16, %s2480_s22, %s1732_s23  }
 0x3aa PF: > { %p1998_p1 = scmp.ge.s32.totalorder %s2127_s27, 2  ;;  %s1756_s20 = sand.u32 1, %s2115_s24  }
 0x3ab   : > { %s1757_s21 = scalar_lea.sflag [#allocation3], %s1756_s20 }
 0x3ac   : > { %p1995_p2 = pnand %p1998_p1, %p2226_p6 }
 0x3ae   : > { %2110 = dma.done.wait (!%p1995_p2), %s1757_s21, 16  }
 0x3af   : > { %2112 = vsyncadd (!%p1995_p2), %s1757_s21, 4294967280  ;;  %p17_p3 = scmp.ge.s32.totalorder %s2209_s30, 4   ;;  %s2532_s24 = smov %s2119_s25 }
 0x3b0   : > { %s2533_s25 = smov %s2123_s26  ;;  %s2534_s26 = smov %s2220_s10 }
 0x3b1   : > { %s2535_s27 = smov %s2209_s30  ;;  %19 = sbr.rel (!%p17_p3) target bundleno = 3 (0x3), region = 99 }
 0x3b8   :  { %1761 = vsyncpa [#allocation3], 1 }
 0x3b9   :  { %1763 = vsyncpa [#allocation3 + $0x1], 1 }

</bundles_post_ra>
